<compile_context>
chip_gen: v7x
topology: tpu7x:2x2x1
jax: 0.10.0
libtpu: 0.0.40
codegen_flags: <defaults>
</compile_context>

<pallas_src>
import functools

import jax
import jax.numpy as jnp
from jax import lax
from jax.experimental import pallas as pl
from jax.experimental.pallas import tpu as pltpu

LANE = 128


def _round_up(x, m):
    return ((x + m - 1) // m) * m


def _cdiv(a, b):
    return -(-a // b)


# ----------------------------- Pallas kernel ------------------------------ #

def _autoreg_net_kernel(x0_ref, *rest, n_layers):
    """Fused AutoregNet forward: all layers in one kernel invocation.

    x0_ref : (TILE_B, K_pad)   == [acts | 0 | state | 0]   (lane-padded)
    rest   : w_f_0, b_f_0, ..., w_f_{L-1}, b_f_{L-1}, out_ref, xbuf
      w_f_k : (N_k_pad, K_pad)  == [W*mask | 0 | wc_tiled | 0], zero pad rows
      b_f_k : (1, N_k_pad)      == [b + tile(bc, delay) | 0]   (f32)
    out_ref : (TILE_B, N_pad_last)  lane-dense full store
    xbuf    : VMEM scratch (TILE_B, K_pad), layout [activation | state],
              activation region starts at lane 0 (aligned stores every layer).
    """
    xbuf_ref = rest[-1]
    out_ref = rest[-2]
    wb_refs = rest[:-2]

    # Seed scratch with the full (zero-padded) input once: puts the state in
    # its fixed lane-aligned tail slot and makes every padded column finite.
    if n_layers > 1:
        xbuf_ref[...] = x0_ref[...]

    x = x0_ref[...]
    for k in range(n_layers):
        w = wb_refs[2 * k][...]          # (N_k_pad, K_pad)
        b = wb_refs[2 * k + 1][...]      # (1, N_k_pad), f32

        # One MXU op per layer: x @ w^T (contract last dims), f32 accumulate.
        out = lax.dot_general(x, w, (((1,), (1,)), ((), ())),
                              preferred_element_type=jnp.float32)
        out = out + b

        if k < n_layers - 1:
            out = jnp.maximum(out, 0.0)                       # ReLU between layers
            # Lane-0-aligned, 128-multiple-width unmasked store; zero-padded
            # columns of `out` overwrite stale-but-finite values with zeros.
            xbuf_ref[:, 0:out.shape[1]] = out.astype(xbuf_ref.dtype)
            x = xbuf_ref[...]
        else:
            out_ref[...] = out.astype(out_ref.dtype)          # Identity at output


# ------------------------------- glue / params ---------------------------- #

def make_autoreg_mask(in_dim, out_dim, delay):
    # mask[l, c] = (c < (1 + l // out_dim) * in_dim), same as the PyTorch buffer.
    l = jnp.arange(out_dim * delay)[:, None]
    c = jnp.arange(in_dim * delay)[None, :]
    return (c < (1 + l // out_dim) * in_dim).astype(jnp.float32)


def init_autoreg_net_params(key, state_dim, action_dims, delay):
    """Deterministic parameter init (PyTorch-Linear-style uniform ranges)."""
    params = []
    for (i, j) in zip(action_dims[:-1], action_dims[1:]):
        key, k1, k2, k3, k4 = jax.random.split(key, 5)
        bound = 1.0 / float(jnp.sqrt(i * delay))
        w = jax.random.uniform(k1, (j * delay, i * delay), jnp.float32, -bound, bound)
        b = jax.random.uniform(k2, (1, j * delay), jnp.float32, -bound, bound)
        cbound = 1.0 / float(jnp.sqrt(state_dim))
        wc = jax.random.uniform(k3, (j, state_dim), jnp.float32, -cbound, cbound)
        bc = jax.random.uniform(k4, (1, j), jnp.float32, -cbound, cbound)
        params.append({"w": w, "b": b, "mask": make_autoreg_mask(i, j, delay),
                       "wc": wc, "bc": bc})
    return params


def prepare_fused_params(params, delay, state_dim, a_pad_max, k_pad,
                         dtype=jnp.float32):
    """Pre-mask, pre-tile, fuse, and lane-pad weights / biases (done once).

    Column layout (shared by every layer): [acts (A_k) | 0 .. a_pad_max |
    state (state_dim) | 0 .. k_pad].  Rows padded to a multiple of 128.
    """
    fused = []
    for p in params:
        n = p["w"].shape[0]                                   # out_action_dim * delay
        a = p["w"].shape[1]                                   # in_action_dim * delay
        n_pad = _round_up(n, LANE)

        w_masked = p["w"] * p["mask"]                         # mask is static -> exact
        wc_tiled = jnp.tile(p["wc"], (delay, 1))              # (n, state_dim)

        w_f = jnp.zeros((n_pad, k_pad), jnp.float32)
        w_f = w_f.at[:n, :a].set(w_masked)
        w_f = w_f.at[:n, a_pad_max:a_pad_max + state_dim].set(wc_tiled)

        b_f = jnp.zeros((1, n_pad), jnp.float32)
        b_f = b_f.at[:, :n].set(p["b"] + jnp.tile(p["bc"], (1, delay)))

        fused.append((w_f.astype(dtype), b_f))                # bias stays f32
    return fused


def autoreg_net_forward(state, actions, params, action_dims, delay,
                        compute_dtype=jnp.float32):
    """AutoregNet.forward — full-sequence case (trunc == delay), one fused kernel.

    compute_dtype=jnp.bfloat16 enables the native bf16 MXU path (f32 accumulate)
    on v6e/v7x; keep jnp.float32 when exact 1e-4 agreement is required.
    """
    # TODO(synk): the PyTorch forward also supports truncated action inputs
    # (trunc < delay) via dynamic weight slicing; only trunc == delay is implemented.
    B, state_dim = state.shape
    n_layers = len(action_dims) - 1
    in_dims = tuple(int(d) for d in action_dims[:-1])
    out_dim_last = action_dims[-1] * delay

    itemsize = jnp.dtype(compute_dtype).itemsize

    # Shared lane-padded geometry for every layer.
    a_pad_max = max(_round_up(d * delay, LANE) for d in in_dims)   # activation slab
    s_pad = _round_up(state_dim, LANE)                             # state slab
    k_pad = a_pad_max + s_pad                                      # contracting width
    n_pad_last = _round_up(out_dim_last, LANE)

    fused = prepare_fused_params(params, delay, state_dim, a_pad_max, k_pad,
                                 dtype=compute_dtype)

    # Build the lane-padded kernel input [acts | 0 | state | 0].
    acts = actions.reshape(B, -1).astype(compute_dtype)
    a0 = in_dims[0] * delay
    x0 = jnp.zeros((B, k_pad), compute_dtype)
    x0 = x0.at[:, :a0].set(acts)
    x0 = x0.at[:, a_pad_max:a_pad_max + state_dim].set(state.astype(compute_dtype))

    # Batch tiling: >= 2 grid steps whenever possible (v7x megacore sharding),
    # tiles up to 2048 rows so single-TC v5e/v6e run as few serial steps as possible.
    b_pad8 = _round_up(B, 8)
    if b_pad8 >= 16:
        n_tiles = max(2, _cdiv(b_pad8, 2048))
        tile_b = _round_up(_cdiv(b_pad8, n_tiles), 8)
    else:
        tile_b = b_pad8
    b_pad = _round_up(b_pad8, tile_b)
    if b_pad != B:
        x0 = jnp.pad(x0, ((0, b_pad - B), (0, 0)))

    # BlockSpecs: x0 / out tiled over the batch grid, weights & biases resident
    # (constant index_map -> DMA'd once).
    in_specs = [pl.BlockSpec((tile_b, k_pad), lambda i: (i, 0))]
    flat_args = [x0]
    flops = 0
    weight_bytes = 0
    for (w_f, b_f) in fused:
        in_specs.append(pl.BlockSpec(w_f.shape, lambda i: (0, 0)))
        in_specs.append(pl.BlockSpec(b_f.shape, lambda i: (0, 0)))
        flat_args += [w_f, b_f]
        flops += 2 * b_pad * int(w_f.shape[0]) * int(w_f.shape[1])
        weight_bytes += int(w_f.size) * itemsize + int(b_f.size) * 4

    cost = pl.CostEstimate(
        flops=flops, transcendentals=0,
        bytes_accessed=itemsize * b_pad * k_pad + 4 * b_pad * n_pad_last
                       + weight_bytes)

    # Conservative VMEM budget: assume the pipeline double-buffers everything
    # (including the grid-invariant weights), plus the activation scratch.
    # TODO(synk): on v7x, single-buffer the constant weight blocks via
    # pipeline_mode=pl.Buffered(1) once that path is exercised at real shapes.
    vmem_need = (2 * weight_bytes
                 + 2 * tile_b * k_pad * itemsize        # input tile
                 + 2 * tile_b * n_pad_last * 4          # output tile
                 + tile_b * k_pad * itemsize)           # xbuf scratch
    vmem_limit = int(min(64 * 1024 * 1024,
                         max(32 * 1024 * 1024, vmem_need + (4 << 20))))

    kernel = functools.partial(_autoreg_net_kernel, n_layers=n_layers)

    out = pl.pallas_call(
        kernel,
        out_shape=jax.ShapeDtypeStruct((b_pad, n_pad_last), jnp.float32),
        grid=(b_pad // tile_b,),
        in_specs=in_specs,
        out_specs=pl.BlockSpec((tile_b, n_pad_last), lambda i: (i, 0)),
        scratch_shapes=[pltpu.VMEM((tile_b, k_pad), compute_dtype)],
        compiler_params=pltpu.CompilerParams(
            dimension_semantics=("parallel",),
            vmem_limit_bytes=vmem_limit),
        cost_estimate=cost,
    )(*flat_args)

    return out[:B, :out_dim_last].reshape(B, delay, action_dims[-1])


def autoreg_net_reference(state, actions, params, action_dims, delay):
    """Pure-JAX reference mirroring the PyTorch code literally."""
    B = state.shape[0]
    acts = actions.reshape(B, -1)
    n_layers = len(action_dims) - 1
    for k, p in enumerate(params):
        out = acts @ (p["w"] * p["mask"]).T + p["b"]
        cond = state @ p["wc"].T + p["bc"]
        out = out + jnp.tile(cond, (1, delay))
        if k < n_layers - 1:
            out = jnp.maximum(out, 0.0)
        acts = out
    return acts.reshape(B, -1, action_dims[-1])


# ----------------------------------- main ---------------------------------- #

if __name__ == "__main__":
    B = 2
    state_dim = 16
    action_dims = (4, 6, 4)   # two AutoregLayers, ReLU in between, Identity at output
    delay = 8

    key = jax.random.PRNGKey(0)
    kp, ks, ka = jax.random.split(key, 3)

    params = init_autoreg_net_params(kp, state_dim, action_dims, delay)
    state = jax.random.normal(ks, (B, state_dim), jnp.float32)
    actions = jax.random.normal(ka, (B, delay, action_dims[0]), jnp.float32)

    out = autoreg_net_forward(state, actions, params, action_dims, delay)
    out = jax.block_until_ready(out)

    ref = autoreg_net_reference(state, actions, params, action_dims, delay)
    assert out.shape == (B, delay, action_dims[-1]), out.shape
    assert jnp.allclose(out, ref, atol=1e-4, rtol=1e-4), "mismatch vs reference"

    print("KERNEL_OK")
</pallas_src>

<mosaic_0001>
module attributes {stable_mosaic.version = 11 : i64} {
  func.func @_autoreg_net_kernel(%arg0: i32, %arg1: memref<8x256xf32, #tpu.memory_space<vmem>>, %arg2: memref<128x256xf32, #tpu.memory_space<vmem>>, %arg3: memref<1x128xf32, #tpu.memory_space<vmem>>, %arg4: memref<128x256xf32, #tpu.memory_space<vmem>>, %arg5: memref<1x128xf32, #tpu.memory_space<vmem>>, %arg6: memref<8x128xf32, #tpu.memory_space<vmem>>, %arg7: memref<8x256xf32, #tpu.memory_space<vmem>>) attributes {dimension_semantics = [#tpu.dimension_semantics<parallel>], iteration_bounds = array<i64: 1>, scalar_prefetch = 0 : i64, scratch_operands = 1 : i64, tpu.core_type = #tpu.core_type<tc>, window_params = [{transform_indices = @transform_0, window_bounds = array<i64: 8, 256>}, {pipeline_mode = #tpu.pipeline_mode<synchronous>, transform_indices = @transform_1, window_bounds = array<i64: 128, 256>}, {pipeline_mode = #tpu.pipeline_mode<synchronous>, transform_indices = @transform_2, window_bounds = array<i64: 1, 128>}, {pipeline_mode = #tpu.pipeline_mode<synchronous>, transform_indices = @transform_3, window_bounds = array<i64: 128, 256>}, {pipeline_mode = #tpu.pipeline_mode<synchronous>, transform_indices = @transform_4, window_bounds = array<i64: 1, 128>}, {transform_indices = @transform_5, window_bounds = array<i64: 8, 128>}]} {
    %c0 = arith.constant 0 : index
    %c0_0 = arith.constant 0 : index
    %0 = vector.load %arg1[%c0, %c0_0] : memref<8x256xf32, #tpu.memory_space<vmem>>, vector<8x256xf32>
    %c0_1 = arith.constant 0 : index
    %c0_2 = arith.constant 0 : index
    %1 = vector.load %arg7[%c0_1, %c0_2] : memref<8x256xf32, #tpu.memory_space<vmem>>, vector<8x256xf32>
    tpu.vector_store %arg7[%c0_1, %c0_2], %0 {strides = array<i32>} : memref<8x256xf32, #tpu.memory_space<vmem>>, vector<8x256xf32>,
    %c0_3 = arith.constant 0 : index
    %c0_4 = arith.constant 0 : index
    %2 = vector.load %arg1[%c0_3, %c0_4] : memref<8x256xf32, #tpu.memory_space<vmem>>, vector<8x256xf32>
    %c0_5 = arith.constant 0 : index
    %c0_6 = arith.constant 0 : index
    %3 = vector.load %arg2[%c0_5, %c0_6] : memref<128x256xf32, #tpu.memory_space<vmem>>, vector<128x256xf32>
    %c0_7 = arith.constant 0 : index
    %c0_8 = arith.constant 0 : index
    %4 = vector.load %arg3[%c0_7, %c0_8] : memref<1x128xf32, #tpu.memory_space<vmem>>, vector<1x128xf32>
    %cst = arith.constant dense<0.000000e+00> : vector<8x128xf32>
    %5 = tpu.matmul %2, %3, %cst {dimension_numbers = #tpu.dot_dimension_numbers<[1], [1], [0], [0], [0, 0, 1, 0], [], []>} : vector<8x256xf32>, vector<128x256xf32>, vector<8x128xf32> -> vector<8x128xf32>
    %6 = vector.broadcast %4 : vector<1x128xf32> to vector<8x128xf32>
    %7 = arith.addf %5, %6 : vector<8x128xf32>
    %cst_9 = arith.constant 0.000000e+00 : f32
    %8 = vector.broadcast %cst_9 : f32 to vector<8x128xf32>
    %9 = arith.maximumf %7, %8 : vector<8x128xf32>
    %c0_10 = arith.constant 0 : index
    %c0_11 = arith.constant 0 : index
    %10 = vector.load %arg7[%c0_10, %c0_11] : memref<8x256xf32, #tpu.memory_space<vmem>>, vector<8x128xf32>
    tpu.vector_store %arg7[%c0_10, %c0_11], %9 {strides = array<i32>} : memref<8x256xf32, #tpu.memory_space<vmem>>, vector<8x128xf32>,
    %c0_12 = arith.constant 0 : index
    %c0_13 = arith.constant 0 : index
    %11 = vector.load %arg7[%c0_12, %c0_13] : memref<8x256xf32, #tpu.memory_space<vmem>>, vector<8x256xf32>
    %c0_14 = arith.constant 0 : index
    %c0_15 = arith.constant 0 : index
    %12 = vector.load %arg4[%c0_14, %c0_15] : memref<128x256xf32, #tpu.memory_space<vmem>>, vector<128x256xf32>
    %c0_16 = arith.constant 0 : index
    %c0_17 = arith.constant 0 : index
    %13 = vector.load %arg5[%c0_16, %c0_17] : memref<1x128xf32, #tpu.memory_space<vmem>>, vector<1x128xf32>
    %cst_18 = arith.constant dense<0.000000e+00> : vector<8x128xf32>
    %14 = tpu.matmul %11, %12, %cst_18 {dimension_numbers = #tpu.dot_dimension_numbers<[1], [1], [0], [0], [0, 0, 1, 0], [], []>} : vector<8x256xf32>, vector<128x256xf32>, vector<8x128xf32> -> vector<8x128xf32>
    %15 = vector.broadcast %13 : vector<1x128xf32> to vector<8x128xf32>
    %16 = arith.addf %14, %15 : vector<8x128xf32>
    %c0_19 = arith.constant 0 : index
    %c0_20 = arith.constant 0 : index
    %17 = vector.load %arg6[%c0_19, %c0_20] : memref<8x128xf32, #tpu.memory_space<vmem>>, vector<8x128xf32>
    tpu.vector_store %arg6[%c0_19, %c0_20], %16 {strides = array<i32>} : memref<8x128xf32, #tpu.memory_space<vmem>>, vector<8x128xf32>,
    return
  }
  func.func @transform_0(%arg0: i32) -> (i32, i32) {
    %c0_i32 = arith.constant 0 : i32
    %c0_i32_0 = arith.constant 0 : i32
    return %arg0, %c0_i32 : i32, i32
  }
  func.func @transform_1(%arg0: i32) -> (i32, i32) {
    %c0_i32 = arith.constant 0 : i32
    %c0_i32_0 = arith.constant 0 : i32
    %c0_i32_1 = arith.constant 0 : i32
    return %c0_i32, %c0_i32_0 : i32, i32
  }
  func.func @transform_2(%arg0: i32) -> (i32, i32) {
    %c0_i32 = arith.constant 0 : i32
    %c0_i32_0 = arith.constant 0 : i32
    %c0_i32_1 = arith.constant 0 : i32
    return %c0_i32, %c0_i32_0 : i32, i32
  }
  func.func @transform_3(%arg0: i32) -> (i32, i32) {
    %c0_i32 = arith.constant 0 : i32
    %c0_i32_0 = arith.constant 0 : i32
    %c0_i32_1 = arith.constant 0 : i32
    return %c0_i32, %c0_i32_0 : i32, i32
  }
  func.func @transform_4(%arg0: i32) -> (i32, i32) {
    %c0_i32 = arith.constant 0 : i32
    %c0_i32_0 = arith.constant 0 : i32
    %c0_i32_1 = arith.constant 0 : i32
    return %c0_i32, %c0_i32_0 : i32, i32
  }
  func.func @transform_5(%arg0: i32) -> (i32, i32) {
    %c0_i32 = arith.constant 0 : i32
    %c0_i32_0 = arith.constant 0 : i32
    return %arg0, %c0_i32 : i32, i32
  }
}

</mosaic_0001>

<bundles_post_ra>
// kernel: tpu_custom_call.1
= control target key start
LH: loop header
LB: loop body
LE: loop exit
PB: predicated region body
PF: predicated region fallthrough
CT: control target
= control target key end

     0   :  { %10 = vsyncpa [#allocation4], 0  ;;  %s567_s0 = inlined_call_operand.hbm [shape: f32[8,256], index: 0, kind: input, shape index: {}]   ;;  %s568_s1 = inlined_call_operand.hbm [shape: f32[128,256], index: 1, kind: input, shape index: {}]   ;;  %s569_s2 = inlined_call_operand.vmem [shape: f32[1,128], index: 2, kind: input, shape index: {}]   ;;  %s570_s3 = inlined_call_operand.hbm [shape: f32[128,256], index: 3, kind: input, shape index: {}]   ;;  %s571_s4 = inlined_call_operand.vmem [shape: f32[1,128], index: 4, kind: input, shape index: {}]   ;;  %s572_s5 = inlined_call_operand.hbm [shape: f32[8,128], index: 5, kind: output, shape index: {}]  }
   0x1   :  { %11 = vsyncpa [#allocation7], 0 }
   0x2   :  { %12 = vsyncpa [#allocation5], 0  ;;  %s471_s18 = smov [#allocation6]   ;;  %s377_s22 = scalar_lea.hbm %s568_s1, 4096 }
   0x3   :  { %s28_s19 = sshll.u32 %s471_s18, 4  ;;  %p378_p0 = scmp.ne.s32.totalorder %s568_s1, %s377_s22  ;;  %s29_s19 = int_to_ptr.vmem [resolvable:$true] %s28_s19 }
   0x4   :  { %p381_p1 = scmp.lt.u32.totalorder %s377_s22, %s568_s1 }
   0x6   :  { %p383_p2 = pnand %p381_p1, %p378_p0 }
   0x8   :  { %386 = shalt.err (!%p383_p2)
}
   0x9   :  { %s387_s27 = scalar_lea.vmem %s29_s19, 4096  ;;  %p392_p4 = scmp.lt.s32.totalorder %s29_s19, %s29_s19 }
   0xa   :  { %p388_p3 = scmp.ne.s32.totalorder %s29_s19, %s387_s27  ;;  %p393_p5 = scmp.lt.s32.totalorder %s387_s27, %s387_s27 }
   0xc   :  { %p394_p6 = por %p393_p5, %p392_p4 }
   0xe   :  { %p395_p7 = pnand %p394_p6, %p388_p3 }
  0x10   :  { %398 = shalt.err (!%p395_p7)
}
  0x11   :  { %s472_s28 = smov 256   ;;  %s473_s29 = smov 16  }
  0x12   :  { %34 = dma.hbm_to_vmem [thread:$0]  %s568_s1, 4096, %s29_s19, [#allocation7], %s472_s28, %s472_s28, %s473_s29  }
  0x13   :  { %s474_s7 = smov [#allocation3]   ;;  %s475_s9 = smov [#allocation8]  }
  0x14   :  { %s19_s8 = sshll.u32 %s474_s7, 4  ;;  %s42_s10 = sshll.u32 %s475_s9, 4  ;;  %s20_s8 = int_to_ptr.vmem [resolvable:$true] %s19_s8  ;;  %s43_s10 = int_to_ptr.vmem [resolvable:$true] %s42_s10 }
  0x15   :  { %s399_s13 = scalar_lea.hbm %s567_s0, 256 }
  0x16   :  { %p400_p8 = scmp.ne.s32.totalorder %s567_s0, %s399_s13  ;;  %p403_p9 = scmp.lt.u32.totalorder %s399_s13, %s567_s0 }
  0x18   :  { %p405_p10 = pnand %p403_p9, %p400_p8 }
  0x1a   :  { %408 = shalt.err (!%p405_p10)
}
  0x1b   :  { %s409_s1 = scalar_lea.vmem %s20_s8, 256  ;;  %p414_p12 = scmp.lt.s32.totalorder %s20_s8, %s20_s8 }
  0x1c   :  { %p410_p11 = scmp.ne.s32.totalorder %s20_s8, %s409_s1  ;;  %p415_p13 = scmp.lt.s32.totalorder %s409_s1, %s409_s1 }
  0x1e   :  { %p416_p0 = por %p415_p13, %p414_p12 }
  0x20   :  { %p417_p1 = pnand %p416_p0, %p410_p11 }
  0x22   :  { %420 = shalt.err (!%p417_p1)
}
  0x23   :  { %22 = dma.hbm_to_vmem [thread:$0]  %s567_s0, 256, %s20_s8, [#allocation4]  }
  0x24   :  { %s421_s22 = scalar_lea.hbm %s570_s3, 4096 }
  0x25   :  { %p422_p2 = scmp.ne.s32.totalorder %s570_s3, %s421_s22  ;;  %p425_p3 = scmp.lt.u32.totalorder %s421_s22, %s570_s3 }
  0x27   :  { %p427_p4 = pnand %p425_p3, %p422_p2 }
  0x29   :  { %430 = shalt.err (!%p427_p4)
}
  0x2a   :  { %s431_s27 = scalar_lea.vmem %s43_s10, 4096  ;;  %p436_p6 = scmp.lt.s32.totalorder %s43_s10, %s43_s10 }
  0x2b   :  { %p432_p5 = scmp.ne.s32.totalorder %s43_s10, %s431_s27  ;;  %p437_p7 = scmp.lt.s32.totalorder %s431_s27, %s431_s27 }
  0x2d   :  { %p438_p8 = por %p437_p7, %p436_p6 }
  0x2f   :  { %p439_p9 = pnand %p438_p8, %p432_p5 }
  0x31   :  { %442 = shalt.err (!%p439_p9)
}
  0x32   :  { %48 = dma.hbm_to_vmem [thread:$0]  %s570_s3, 4096, %s43_s10, [#allocation7], %s472_s28, %s472_s28, %s473_s29  }
  0x33   :  { %465 = dma.done.wait [#allocation4], 256  }
  0x34   :  { %466 = vsyncadd [#allocation4], 4294967040 }
  0x35   :  { %467 = dma.done.wait [#allocation7], 8192  }
  0x36   :  { %468 = vsyncadd [#allocation7], 4294959104  ;;  %v67_v0 = vld [vmem:[#allocation6 + $0x8] sm:$0xff]  ;;  %v69_v1 = vld [vmem:[#allocation6 + $0x18] sm:$0xff]  ;;  %s476_s7 = smov [#allocation9]  }
  0x37   :  { %v66_v2 = vld [vmem:[#allocation6] sm:$0xff]  ;;  %v307_v3 = vpack.c.bf16 %v69_v1, %v67_v0  ;;  %v68_v4 = vld [vmem:[#allocation6 + $0x10] sm:$0xff]  ;;  %v71_v5 = vld [vmem:[#allocation6 + $0x28] sm:$0xff]  ;;  %s295_s8 = sshll.u32 %s476_s7, 4  ;;  %s296_s8 = int_to_ptr.vmem [resolvable:$true] %s295_s8 }
  0x38   :  { %v73_v6 = vld [vmem:[#allocation6 + $0x38] sm:$0xff]  ;;  %v309_v7 = vpack.c.bf16 %v68_v4, %v66_v2  ;;  %v70_v9 = vld [vmem:[#allocation6 + $0x20] sm:$0xff]  ;;  %v72_v10 = vld [vmem:[#allocation6 + $0x30] sm:$0xff]  ;;  %s443_s9 = scalar_lea.vmem %s296_s8, 128  ;;  %p448_p11 = scmp.lt.s32.totalorder %s296_s8, %s296_s8 }
  0x39   :  { %v311_v8 = vpack.c.bf16 %v73_v6, %v71_v5  ;;  %308 = vmatprep.subr.bf16.mxu0 %v307_v3  ;;  %v75_v11 = vld [vmem:[#allocation6 + $0x48] sm:$0xff]  ;;  %v77_v12 = vld [vmem:[#allocation6 + $0x58] sm:$0xff]  ;;  %v313_v13 = vpack.c.bf16 %v72_v10, %v70_v9  ;;  %v179_v19 = vld [vmem:[#allocation8] sm:$0xff]  ;;  %p444_p10 = scmp.ne.s32.totalorder %s296_s8, %s443_s9  ;;  %p449_p12 = scmp.lt.s32.totalorder %s443_s9, %s443_s9 }
  0x3a   :  { %310 = vmatpush1.bf16.xpose.msra.mxu0 %v309_v7  ;;  %v315_v14 = vpack.c.bf16 %v77_v12, %v75_v11  ;;  %v65_v15 = vld [vmem:[#allocation3 + $0x8] sm:$0xff]  ;;  %v180_v16 = vld [vmem:[#allocation8 + $0x8] sm:$0xff]  ;;  %v181_v20 = vld [vmem:[#allocation8 + $0x10] sm:$0xff] }
  0x3b   :  { %312 = vmatprep.subr.bf16.mxu0 %v311_v8  ;;  %169 = vmatprep.mubr.f32.mxu0 %v65_v15  ;;  %v182_v17 = vld [vmem:[#allocation8 + $0x18] sm:$0xff]  ;;  %v184_v21 = vld [vmem:[#allocation8 + $0x28] sm:$0xff]  ;;  %v74_v22 = vld [vmem:[#allocation6 + $0x40] sm:$0xff]  ;;  %v341_v24 = vpack.c.bf16 %v181_v20, %v179_v19  ;;  %p450_p13 = por %p449_p12, %p448_p11 }
  0x3c   :  { %282 = vmatprep.mubr.f32.mxu1 %v65_v15  ;;  %v339_v18 = vpack.c.bf16 %v182_v17, %v180_v16  ;;  %v76_v23 = vld [vmem:[#allocation6 + $0x50] sm:$0xff]  ;;  %v186_v25 = vld [vmem:[#allocation8 + $0x38] sm:$0xff]  ;;  %v79_v26 = vld [vmem:[#allocation6 + $0x68] sm:$0xff] }
  0x3d   :  { %v81_v27 = vld [vmem:[#allocation6 + $0x78] sm:$0xff]  ;;  %v343_v28 = vpack.c.bf16 %v186_v25, %v184_v21  ;;  %v317_v29 = vpack.c.bf16 %v76_v23, %v74_v22  ;;  %v183_v30 = vld [vmem:[#allocation8 + $0x20] sm:$0xff]  ;;  %v185_v31 = vld [vmem:[#allocation8 + $0x30] sm:$0xff]  ;;  %p451_p0 = pnand %p450_p13, %p444_p10 }
  0x3e   :  { %340 = vmatprep.subr.bf16.mxu1 %v339_v18  ;;  %v319_v32 = vpack.c.bf16 %v81_v27, %v79_v26  ;;  %v188_v33 = vld [vmem:[#allocation8 + $0x48] sm:$0xff]  ;;  %v190_v34 = vld [vmem:[#allocation8 + $0x58] sm:$0xff]  ;;  %v345_v35 = vpack.c.bf16 %v185_v31, %v183_v30  ;;  %v78_v37 = vld [vmem:[#allocation6 + $0x60] sm:$0xff] }
  0x3f   :  { %342 = vmatpush1.bf16.xpose.msra.mxu1 %v341_v24  ;;  %v347_v36 = vpack.c.bf16 %v190_v34, %v188_v33  ;;  %v80_v38 = vld [vmem:[#allocation6 + $0x70] sm:$0xff]  ;;  %v83_v39 = vld [vmem:[#allocation6 + $0x88] sm:$0xff]  ;;  %v85_v40 = vld [vmem:[#allocation6 + $0x98] sm:$0xff] }
  0x40   :  { %344 = vmatprep.subr.bf16.mxu1 %v343_v28  ;;  %v321_v41 = vpack.c.bf16 %v80_v38, %v78_v37  ;;  %v187_v42 = vld [vmem:[#allocation8 + $0x40] sm:$0xff]  ;;  %v189_v43 = vld [vmem:[#allocation8 + $0x50] sm:$0xff]  ;;  %v323_v44 = vpack.c.bf16 %v85_v40, %v83_v39  ;;  %v192_v45 = vld [vmem:[#allocation8 + $0x68] sm:$0xff] }
  0x41   :  { %v194_v46 = vld [vmem:[#allocation8 + $0x78] sm:$0xff]  ;;  %v349_v47 = vpack.c.bf16 %v189_v43, %v187_v42  ;;  %v82_v49 = vld [vmem:[#allocation6 + $0x80] sm:$0xff]  ;;  %v84_v50 = vld [vmem:[#allocation6 + $0x90] sm:$0xff] }
  0x42   :  { %314 = vmatpush1.bf16.xpose.msra.mxu0 %v313_v13  ;;  %v351_v48 = vpack.c.bf16 %v194_v46, %v192_v45  ;;  %v87_v51 = vld [vmem:[#allocation6 + $0xa8] sm:$0xff]  ;;  %v89_v52 = vld [vmem:[#allocation6 + $0xb8] sm:$0xff]  ;;  %v325_v53 = vpack.c.bf16 %v84_v50, %v82_v49  ;;  %v191_v54 = vld [vmem:[#allocation8 + $0x60] sm:$0xff] }
  0x43   :  { %316 = vmatprep.subr.bf16.mxu0 %v315_v14  ;;  %v193_v55 = vld [vmem:[#allocation8 + $0x70] sm:$0xff]  ;;  %v327_v56 = vpack.c.bf16 %v89_v52, %v87_v51  ;;  %v196_v57 = vld [vmem:[#allocation8 + $0x88] sm:$0xff]  ;;  %v198_v58 = vld [vmem:[#allocation8 + $0x98] sm:$0xff] }
  0x44   :  { %v353_v59 = vpack.c.bf16 %v193_v55, %v191_v54  ;;  %v355_v60 = vpack.c.bf16 %v198_v58, %v196_v57  ;;  %v86_v61 = vld [vmem:[#allocation6 + $0xa0] sm:$0xff]  ;;  %v88_v62 = vld [vmem:[#allocation6 + $0xb0] sm:$0xff]  ;;  %v91_v63 = vld [vmem:[#allocation6 + $0xc8] sm:$0xff] }
  0x45   :  { %v93_v0 = vld [vmem:[#allocation6 + $0xd8] sm:$0xff]  ;;  %v329_v1 = vpack.c.bf16 %v88_v62, %v86_v61  ;;  %v195_v2 = vld [vmem:[#allocation8 + $0x80] sm:$0xff]  ;;  %v197_v3 = vld [vmem:[#allocation8 + $0x90] sm:$0xff] }
  0x46   :  { %v331_v4 = vpack.c.bf16 %v93_v0, %v91_v63  ;;  %v200_v5 = vld [vmem:[#allocation8 + $0xa8] sm:$0xff]  ;;  %v202_v6 = vld [vmem:[#allocation8 + $0xb8] sm:$0xff]  ;;  %v357_v7 = vpack.c.bf16 %v197_v3, %v195_v2  ;;  %v90_v9 = vld [vmem:[#allocation6 + $0xc0] sm:$0xff] }
  0x47   :  { %346 = vmatpush1.bf16.xpose.msra.mxu1 %v345_v35  ;;  %v359_v8 = vpack.c.bf16 %v202_v6, %v200_v5  ;;  %v92_v10 = vld [vmem:[#allocation6 + $0xd0] sm:$0xff]  ;;  %v95_v11 = vld [vmem:[#allocation6 + $0xe8] sm:$0xff]  ;;  %v97_v12 = vld [vmem:[#allocation6 + $0xf8] sm:$0xff] }
  0x48   :  { %348 = vmatprep.subr.bf16.mxu1 %v347_v36  ;;  %v333_v13 = vpack.c.bf16 %v92_v10, %v90_v9  ;;  %v199_v14 = vld [vmem:[#allocation8 + $0xa0] sm:$0xff]  ;;  %v201_v15 = vld [vmem:[#allocation8 + $0xb0] sm:$0xff]  ;;  %v335_v16 = vpack.c.bf16 %v97_v12, %v95_v11  ;;  %v204_v17 = vld [vmem:[#allocation8 + $0xc8] sm:$0xff] }
  0x49   :  { %v206_v18 = vld [vmem:[#allocation8 + $0xd8] sm:$0xff]  ;;  %v361_v19 = vpack.c.bf16 %v201_v15, %v199_v14  ;;  %v94_v21 = vld [vmem:[#allocation6 + $0xe0] sm:$0xff]  ;;  %v96_v22 = vld [vmem:[#allocation6 + $0xf0] sm:$0xff] }
  0x4a   :  { %318 = vmatpush1.bf16.xpose.msra.mxu0 %v317_v29  ;;  %v363_v20 = vpack.c.bf16 %v206_v18, %v204_v17  ;;  %v337_v23 = vpack.c.bf16 %v96_v22, %v94_v21  ;;  %v203_v24 = vld [vmem:[#allocation8 + $0xc0] sm:$0xff]  ;;  %v205_v25 = vld [vmem:[#allocation8 + $0xd0] sm:$0xff]  ;;  %v208_v26 = vld [vmem:[#allocation8 + $0xe8] sm:$0xff] }
  0x4b   :  { %320 = vmatprep.subr.bf16.mxu0 %v319_v32  ;;  %v210_v27 = vld [vmem:[#allocation8 + $0xf8] sm:$0xff]  ;;  %v365_v28 = vpack.c.bf16 %v205_v25, %v203_v24  ;;  %v64_v30 = vld [vmem:[#allocation3] sm:$0xff]  ;;  %v207_v31 = vld [vmem:[#allocation8 + $0xe0] sm:$0xff] }
  0x4c   :  { %v367_v29 = vpack.c.bf16 %v210_v27, %v208_v26  ;;  %v209_v32 = vld [vmem:[#allocation8 + $0xf0] sm:$0xff] }
  0x4d   :  { %v369_v33 = vpack.c.bf16 %v209_v32, %v207_v31  ;;  %v305_v34 = vld [vmem:[%s569_s2] ss:$0 sm:$0xff] }
  0x4e   :  { %v306_v39 = vld [vmem:[%s571_s4] ss:$0 sm:$0xff] }
  0x4f   :  { %350 = vmatpush1.bf16.xpose.msra.mxu1 %v349_v47 }
  0x50   :  { %352 = vmatprep.subr.bf16.mxu1 %v351_v48 }
  0x52   :  { %322 = vmatpush1.bf16.xpose.msra.mxu0 %v321_v41 }
  0x53   :  { %324 = vmatprep.subr.bf16.mxu0 %v323_v44 }
  0x57   :  { %354 = vmatpush1.bf16.xpose.msra.mxu1 %v353_v59 }
  0x58   :  { %356 = vmatprep.subr.bf16.mxu1 %v355_v60 }
  0x5a   :  { %326 = vmatpush1.bf16.xpose.msra.mxu0 %v325_v53 }
  0x5b   :  { %328 = vmatprep.subr.bf16.mxu0 %v327_v56 }
  0x5f   :  { %358 = vmatpush1.bf16.xpose.msra.mxu1 %v357_v7 }
  0x60   :  { %360 = vmatprep.subr.bf16.mxu1 %v359_v8 }
  0x62   :  { %330 = vmatpush1.bf16.xpose.msra.mxu0 %v329_v1 }
  0x63   :  { %332 = vmatprep.subr.bf16.mxu0 %v331_v4 }
  0x67   :  { %362 = vmatpush1.bf16.xpose.msra.mxu1 %v361_v19 }
  0x68   :  { %364 = vmatprep.subr.bf16.mxu1 %v363_v20 }
  0x6a   :  { %334 = vmatpush1.bf16.xpose.msra.mxu0 %v333_v13 }
  0x6b   :  { %336 = vmatprep.subr.bf16.mxu0 %v335_v16 }
  0x6f   :  { %366 = vmatpush1.bf16.xpose.msra.mxu1 %v365_v28 }
  0x70   :  { %368 = vmatprep.subr.bf16.mxu1 %v367_v29 }
  0x72   :  { %338 = vmatpush1.bf16.xpose.msra.mxu0 %v337_v23 }
  0x77   :  { %370 = vmatpush1.bf16.xpose.msra.mxu1 %v369_v33 }
  0x79   :  { %170 = vmatmul.mubr.f32.vlgmr.msra.gmra.mrb[0].mxu0 %v64_v30 }
 0x14c   :  { %v171_v35 = vpop.f32.mrb[0].mxu0 }
 0x14d   :  { %v172_v36 = vadd.f32 %v305_v34, %v171_v35  ;;  %v173_v37 = vpop.f32.mrb[1].mxu0 }
 0x14f   :  { %v175_v38 = vmax.f32 %v172_v36, 0.0 }
 0x151   :  { %283 = vmatmul.mubr.f32.vlgmr.msra.gmra.mrb[0].mxu1 %v175_v38 }
 0x224   :  { %v284_v40 = vpop.f32.mrb[0].mxu1 }
 0x225   :  { %v285_v41 = vadd.f32 %v306_v39, %v284_v40  ;;  %v286_v42 = vpop.f32.mrb[1].mxu1 }
 0x227   :  { %288 = vst [vmem:[#allocation9] sm:$0xff] %v285_v41 }
 0x228   :  { %454 = shalt.err (!%p451_p0)
}
 0x229   :  { %s455_s11 = scalar_lea.hbm %s572_s5, 128 }
 0x22a   :  { %p456_p1 = scmp.ne.s32.totalorder %s572_s5, %s455_s11  ;;  %p459_p2 = scmp.lt.u32.totalorder %s455_s11, %s572_s5 }
 0x22c   :  { %p461_p3 = pnand %p459_p2, %p456_p1 }
 0x22e   :  { %464 = shalt.err (!%p461_p3)
}
 0x22f   :  { %298 = dma.vmem_to_hbm [thread:$0]  %s296_s8, 128, %s572_s5, [#allocation5]  }
 0x230   :  { %469 = dma.done.wait [#allocation5], 128  }
 0x231   :  { %470 = vsyncadd [#allocation5], 4294967168 }
 0x232   :  { %302 = vsyncpa [#allocation4], 1 }
 0x233   :  { %303 = vsyncpa [#allocation7], 1 }
 0x234   :  { %304 = vsyncpa [#allocation5], 1 }

</bundles_post_ra>
